<compile_context>
chip_gen: v7x
topology: tpu7x:2x2x1
jax: 0.10.0
libtpu: 0.0.40
codegen_flags: <defaults>
</compile_context>

<pallas_src>
import functools

import jax
import jax.numpy as jnp
from jax import lax
from jax.experimental import pallas as pl
from jax.experimental.pallas import tpu as pltpu

LANE = 128           # lane width (last dim of every block)
MAX_TM = 4096        # max rows per block: 2 MiB x + 2 MiB t per grid step
STRIP_ROWS = 512     # rows per in-kernel strip (bounds VMEM temps ~256 KiB)


def _elem_loss(x, t):
    """Per-element focal loss (gamma=2), numerically stable, NaN/Inf -> 0."""
    x = x.astype(jnp.float32)
    t = t.astype(jnp.float32)
    # Single-compare sanitization: |x| < inf is False for NaN and +/-Inf.
    ax = jnp.abs(x)
    finite = ax < jnp.inf
    x = jnp.where(finite, x, 0.0)
    ax = jnp.where(finite, ax, 0.0)
    # One transcendental, reused for both the BCE term and the sigmoid.
    e = jnp.exp(-ax)
    # Stable BCE-with-logits: max(x,0) - x*t + log1p(exp(-|x|))
    bce = jnp.maximum(x, 0.0) - x * t + jnp.log1p(e)
    r = pl.reciprocal(1.0 + e)   # exact; approx=True possible if tol relaxed
    # sigmoid symmetry: p = r (x>=0) or e*r (x<0); 1-p is the other one.
    # Focal factor w = (1-p) if t>=0.5 else p  ==  e*r when sign(x) "agrees"
    # with the target side, else r.
    agree = jnp.logical_xor(x < 0.0, t >= 0.5)
    w = jnp.where(agree, e * r, r)
    return w * (w * bce)


def _block_psum(x_ref, t_ref, *, sr, ns, bound):
    """Sum of per-element losses of this block, folded into one (8,128) vreg."""

    def strip_psum(x, t, row0):
        loss = _elem_loss(x, t)
        if bound is not None:
            # Mask the padded / out-of-bounds tail (last block only).
            row = lax.broadcasted_iota(jnp.int32, loss.shape, 0)
            lane = lax.broadcasted_iota(jnp.int32, loss.shape, 1)
            idx = (row0 + row) * LANE + lane   # block-local -> no i32 overflow
            loss = jnp.where(idx < bound, loss, 0.0)
        # (sr,128) -> (sr//8, 8, 128) -> pure vreg adds; no cross-lane reduce.
        return jnp.sum(loss.reshape(-1, 8, LANE), axis=0)

    if ns == 1:
        return strip_psum(x_ref[...], t_ref[...], 0)

    def body(s, acc):
        r0 = pl.multiple_of(s * sr, sr)
        return acc + strip_psum(x_ref[pl.ds(r0, sr), :],
                                t_ref[pl.ds(r0, sr), :], r0)

    return lax.fori_loop(0, ns, body, jnp.zeros((8, LANE), jnp.float32))


def _focal_kernel(x_ref, t_ref, out_ref, *, sr, ns, nb, mask_last, valid_last):
    if not mask_last:
        out_ref[...] = _block_psum(
            x_ref, t_ref, sr=sr, ns=ns, bound=None).reshape(1, 8, LANE)
    elif nb == 1:
        out_ref[...] = _block_psum(
            x_ref, t_ref, sr=sr, ns=ns, bound=valid_last).reshape(1, 8, LANE)
    else:
        is_last = pl.program_id(0) == pl.num_programs(0) - 1

        @pl.when(jnp.logical_not(is_last))
        def _():
            out_ref[...] = _block_psum(
                x_ref, t_ref, sr=sr, ns=ns, bound=None).reshape(1, 8, LANE)

        @pl.when(is_last)
        def _():
            out_ref[...] = _block_psum(
                x_ref, t_ref, sr=sr, ns=ns, bound=valid_last).reshape(1, 8, LANE)


def focal_loss(inputs: dict, target: jnp.ndarray) -> jnp.ndarray:
    """Pallas implementation of FocalLoss.forward (gamma=2). Returns scalar f32."""
    logit = inputs["logit"]
    total = int(logit.size)

    x = logit.reshape(-1)
    if x.dtype != jnp.float32:
        x = x.astype(jnp.float32)
    t = target.reshape(-1)
    if t.dtype != jnp.float32:
        t = t.astype(jnp.float32)  # mirrors target.float() in the reference
    # TODO(synk): if the producer can emit int8/bool targets, read them
    # directly in-kernel (with tm % 32 == 0) to cut target HBM traffic 4x.

    # Pad only to a whole number of (8,128) vregs (usually pad == 0).
    total_pad = pl.cdiv(total, 8 * LANE) * (8 * LANE)
    pad = total_pad - total
    if pad:
        x = jnp.pad(x, (0, pad))
        t = jnp.pad(t, (0, pad))

    M = total_pad // LANE                       # lane-rows; multiple of 8
    # Row tile: large blocks to amortize per-step overhead, but >= 2 blocks as
    # soon as M > 8 so v7x's second TensorCore gets work on the parallel axis.
    want = min(MAX_TM, max(8, pl.cdiv(M, 2 * 8) * 8))
    if want >= STRIP_ROWS:
        tm = min(MAX_TM, pl.cdiv(want, STRIP_ROWS) * STRIP_ROWS)
        sr = STRIP_ROWS
    else:
        tm, sr = want, want
    ns = tm // sr
    nb = pl.cdiv(M, tm)

    valid_last = total - (nb - 1) * tm * LANE   # valid elems in the last block
    mask_last = valid_last < tm * LANE

    x2d = x.reshape(M, LANE)
    t2d = t.reshape(M, LANE)

    kernel = functools.partial(_focal_kernel, sr=sr, ns=ns, nb=nb,
                               mask_last=mask_last, valid_last=valid_last)

    partials = pl.pallas_call(
        kernel,
        out_shape=jax.ShapeDtypeStruct((nb, 8, LANE), jnp.float32),
        grid_spec=pltpu.PrefetchScalarGridSpec(
            num_scalar_prefetch=0,
            grid=(nb,),
            in_specs=[
                pl.BlockSpec((tm, LANE), lambda i: (i, 0)),
                pl.BlockSpec((tm, LANE), lambda i: (i, 0)),
            ],
            out_specs=pl.BlockSpec((1, 8, LANE), lambda i: (i, 0, 0)),
        ),
        compiler_params=pltpu.CompilerParams(
            dimension_semantics=("parallel",),
            vmem_limit_bytes=32 * 1024 * 1024),
    )(x2d, t2d)

    # Tiny final cross-lane reduction (nb x 8 x 128 floats) + mean in wrapper.
    return jnp.sum(partials) / total


def _reference(inputs, target):
    x = inputs["logit"].astype(jnp.float32)
    x = jnp.where(jnp.isnan(x) | jnp.isinf(x), 0.0, x)
    t = target.astype(jnp.float32)
    bce = jnp.maximum(x, 0.0) - x * t + jnp.log1p(jnp.exp(-jnp.abs(x)))
    p = jax.nn.sigmoid(x)
    loss = jnp.where(t >= 0.5, (1.0 - p) ** 2 * bce, p ** 2 * bce)
    return jnp.mean(loss)


if __name__ == "__main__":
    key = jax.random.PRNGKey(0)
    k1, k2, k3, k4, k5, k6 = jax.random.split(key, 6)

    # Test 1: NCHW-like (2,4,16,16): 2048 elems, 2 grid blocks, no masking.
    shape1 = (2, 4, 16, 16)
    logits1 = jax.random.normal(k1, shape1, dtype=jnp.float32) * 2.0
    logits1 = logits1.at[0, 0, 0, 0].set(jnp.nan)    # exercise sanitization
    logits1 = logits1.at[1, 2, 3, 4].set(jnp.inf)
    logits1 = logits1.at[1, 3, 5, 6].set(-jnp.inf)
    target1 = (jax.random.uniform(k2, shape1) > 0.5).astype(jnp.float32)
    out1 = jax.block_until_ready(focal_loss({"logit": logits1}, target1))
    ref1 = _reference({"logit": logits1}, target1)
    assert jnp.allclose(out1, ref1, atol=1e-5, rtol=1e-5), (out1, ref1)

    # Test 2: ragged size (2,3,13,17) -> small pad + masked last block.
    shape2 = (2, 3, 13, 17)
    logits2 = jax.random.normal(k3, shape2, dtype=jnp.float32) * 3.0
    target2 = (jax.random.uniform(k4, shape2) > 0.5).astype(jnp.float32)
    out2 = jax.block_until_ready(focal_loss({"logit": logits2}, target2))
    ref2 = _reference({"logit": logits2}, target2)
    assert jnp.allclose(out2, ref2, atol=1e-5, rtol=1e-5), (out2, ref2)

    # Test 3: (3,5,9,21) -> partial last block (OOB rows) + pad, both masked.
    shape3 = (3, 5, 9, 21)
    logits3 = jax.random.normal(k5, shape3, dtype=jnp.float32) * 2.5
    target3 = (jax.random.uniform(k6, shape3) > 0.5).astype(jnp.float32)
    out3 = jax.block_until_ready(focal_loss({"logit": logits3}, target3))
    ref3 = _reference({"logit": logits3}, target3)
    assert jnp.allclose(out3, ref3, atol=1e-5, rtol=1e-5), (out3, ref3)

    print("KERNEL_OK")
</pallas_src>

<mosaic_0001>
module attributes {stable_mosaic.version = 11 : i64} {
  func.func @_focal_kernel(%arg0: i32, %arg1: memref<8x128xf32, #tpu.memory_space<vmem>>, %arg2: memref<8x128xf32, #tpu.memory_space<vmem>>, %arg3: memref<1x8x128xf32, #tpu.memory_space<vmem>>) attributes {dimension_semantics = [#tpu.dimension_semantics<parallel>], iteration_bounds = array<i64: 2>, scalar_prefetch = 0 : i64, scratch_operands = 0 : i64, tpu.core_type = #tpu.core_type<tc>, window_params = [{transform_indices = @transform_0, window_bounds = array<i64: 8, 128>}, {transform_indices = @transform_1, window_bounds = array<i64: 8, 128>}, {transform_indices = @transform_2, window_bounds = array<i64: 1, 8, 128>}]} {
    %c0 = arith.constant 0 : index
    %c0_0 = arith.constant 0 : index
    %0 = vector.load %arg1[%c0, %c0_0] : memref<8x128xf32, #tpu.memory_space<vmem>>, vector<8x128xf32>
    %c0_1 = arith.constant 0 : index
    %c0_2 = arith.constant 0 : index
    %1 = vector.load %arg2[%c0_1, %c0_2] : memref<8x128xf32, #tpu.memory_space<vmem>>, vector<8x128xf32>
    %2 = math.absf %0 : vector<8x128xf32>
    %cst = arith.constant 0x7F800000 : f32
    %3 = vector.broadcast %cst : f32 to vector<8x128xf32>
    %4 = arith.cmpf olt, %2, %3 : vector<8x128xf32>
    %cst_3 = arith.constant 0.000000e+00 : f32
    %5 = vector.broadcast %cst_3 : f32 to vector<8x128xf32>
    %6 = arith.select %4, %0, %5 : vector<8x128xi1>, vector<8x128xf32>
    %cst_4 = arith.constant 0.000000e+00 : f32
    %7 = vector.broadcast %cst_4 : f32 to vector<8x128xf32>
    %8 = arith.select %4, %2, %7 : vector<8x128xi1>, vector<8x128xf32>
    %cst_5 = arith.constant 0.000000e+00 : f32
    %9 = vector.broadcast %cst_5 : f32 to vector<8x128xf32>
    %10 = arith.subf %9, %8 : vector<8x128xf32>
    %11 = math.exp %10 : vector<8x128xf32>
    %cst_6 = arith.constant 0.000000e+00 : f32
    %12 = vector.broadcast %cst_6 : f32 to vector<8x128xf32>
    %13 = arith.maximumf %6, %12 : vector<8x128xf32>
    %14 = arith.mulf %6, %1 : vector<8x128xf32>
    %15 = arith.subf %13, %14 : vector<8x128xf32>
    %16 = math.log1p %11 : vector<8x128xf32>
    %17 = arith.addf %15, %16 : vector<8x128xf32>
    %cst_7 = arith.constant 1.000000e+00 : f32
    %18 = vector.broadcast %cst_7 : f32 to vector<8x128xf32>
    %19 = arith.addf %18, %11 : vector<8x128xf32>
    %20 = tpu.reciprocal %19 : vector<8x128xf32> -> vector<8x128xf32>
    %cst_8 = arith.constant 0.000000e+00 : f32
    %21 = vector.broadcast %cst_8 : f32 to vector<8x128xf32>
    %22 = arith.cmpf olt, %6, %21 : vector<8x128xf32>
    %cst_9 = arith.constant 5.000000e-01 : f32
    %23 = vector.broadcast %cst_9 : f32 to vector<8x128xf32>
    %24 = arith.cmpf oge, %1, %23 : vector<8x128xf32>
    %25 = arith.xori %22, %24 : vector<8x128xi1>
    %26 = arith.mulf %11, %20 : vector<8x128xf32>
    %27 = arith.select %25, %26, %20 : vector<8x128xi1>, vector<8x128xf32>
    %28 = arith.mulf %27, %17 : vector<8x128xf32>
    %29 = arith.mulf %27, %28 : vector<8x128xf32>
    %30 = vector.shape_cast %29 : vector<8x128xf32> to vector<1x8x128xf32>
    %cst_10 = arith.constant dense<0.000000e+00> : vector<8x128xf32>
    %31 = vector.multi_reduction <add>, %30, %cst_10 [0] : vector<1x8x128xf32> to vector<8x128xf32>
    %32 = vector.shape_cast %31 : vector<8x128xf32> to vector<1x8x128xf32>
    %c0_11 = arith.constant 0 : index
    %c0_12 = arith.constant 0 : index
    %c0_13 = arith.constant 0 : index
    %33 = vector.load %arg3[%c0_11, %c0_12, %c0_13] : memref<1x8x128xf32, #tpu.memory_space<vmem>>, vector<1x8x128xf32>
    tpu.vector_store %arg3[%c0_11, %c0_12, %c0_13], %32 {strides = array<i32>} : memref<1x8x128xf32, #tpu.memory_space<vmem>>, vector<1x8x128xf32>,
    return
  }
  func.func @transform_0(%arg0: i32) -> (i32, i32) {
    %c0_i32 = arith.constant 0 : i32
    %c0_i32_0 = arith.constant 0 : i32
    return %arg0, %c0_i32 : i32, i32
  }
  func.func @transform_1(%arg0: i32) -> (i32, i32) {
    %c0_i32 = arith.constant 0 : i32
    %c0_i32_0 = arith.constant 0 : i32
    return %arg0, %c0_i32 : i32, i32
  }
  func.func @transform_2(%arg0: i32) -> (i32, i32, i32) {
    %c0_i32 = arith.constant 0 : i32
    %c0_i32_0 = arith.constant 0 : i32
    %c0_i32_1 = arith.constant 0 : i32
    return %arg0, %c0_i32, %c0_i32_0 : i32, i32, i32
  }
}

</mosaic_0001>

<bundles_post_ra>
// kernel: tpu_custom_call.1
= control target key start
LH: loop header
LB: loop body
LE: loop exit
PB: predicated region body
PF: predicated region fallthrough
CT: control target
= control target key end

     0   :  { %7 = vsyncpa [#allocation3], 0  ;;  %s772_s0 = inlined_call_operand.hbm [shape: f32[16,128], index: 0, kind: input, shape index: {}]   ;;  %s773_s1 = inlined_call_operand.hbm [shape: f32[16,128], index: 1, kind: input, shape index: {}]   ;;  %s774_s2 = inlined_call_operand.hbm [shape: f32[2,8,128], index: 2, kind: output, shape index: {}]  }
   0x1   :  { %9 = vsyncpa [#allocation3 + $0x1], 0 }
   0x2   :  { %10 = vsyncpa [#allocation6], 0 }
   0x3   :  { %12 = vsyncpa [#allocation6 + $0x1], 0 }
   0x4   :  { %13 = vsyncpa [#allocation4], 0 }
   0x5   :  { %15 = vsyncpa [#allocation4 + $0x1], 0  ;;  %s558_s9 = smov 0   ;;  %s560_s10 = smov 0  }
   0x6   :  { %s562_s11 = smov 0   ;;  %s564_s12 = smov 0  }
   0x7 LB: > { %s579_s13 = sadd.s32 4294967295, %s538_s12   ;;  %s336_s14 = sadd.s32 4294967294, %s538_s12   ;;  %s538_s12 = sphi %s564_s12, %s793_s12   ;;  %s534_s11 = sphi %s562_s11, %s792_s11   ;;  %s530_s10 = sphi %s560_s10, %s791_s10   ;;  %s526_s9 = sphi %s558_s9, %s790_s9  }
   0x8   : > { %s583_s15 = sadd.s32 1, %s538_s12   ;;  %s28_s16 = sadd.s32 1, %s534_s11 }
   0x9   : > { %s25_s17 = ssub.s32 %s538_s12, %s583_s15  ;;  %p35_p0 = scmp.ne.s32.totalorder %s534_s11, %s530_s10 }
   0xa   : > { %p26_p1 = scmp.eq.s32.totalorder %s25_s17, 0  ;;  %p36_p2 = scmp.eq.s32.totalorder %s538_s12, 0 }
   0xb   : > { %p41_p3 = scmp.ne.s32.totalorder %s530_s10, %s526_s9  ;;  %p42_p4 = scmp.eq.s32.totalorder %s579_s13, 0 }
   0xc   : > { %s595_s18 = scalar_select %p26_p1, %s534_s11, %s28_s16  }
   0xd   : > { %p597_p5 = por %p36_p2, %p35_p0  ;;  %p601_p6 = por %p42_p4, %p41_p3 }
   0xe   : > { %p91_p7 = scmp.eq.s32.totalorder %s579_s13, 1  ;;  %p97_p8 = scmp.eq.s32.totalorder %s336_s14, 1 }
   0xf   : > { %s778_s20 = scalar_select %p601_p6, 1, 0 }
  0x10   : > { %p368_p10 = scmp.lt.s32.totalorder %s538_s12, 2  ;;  %p608_p11 = por %p91_p7, %p35_p0 }
  0x11   : > { %p612_p12 = por %p97_p8, %p41_p3  ;;  %s617_s23 = sand.u32 1, %s534_s11  }
  0x12   : > { %s779_s21 = scalar_select %p608_p11, 1, 0 }
  0x13   : > { %s780_s22 = scalar_select %p612_p12, 1, 0 }
  0x14   : > { %s340_s24 = sshll.u32 %s538_s12, 7  ;;  %s339_s25 = sshll.u32 %s617_s23, 3 }
  0x15   : > { %s626_s28 = scalar_lea.hbm %s772_s0, %s340_s24  ;;  %s121_s29 = scalar_lea.vmem [#allocation2], %s339_s25 }
  0x16   : > { %s128_s30 = sshll.u32 %s121_s29, 4  ;;  %p632_p13 = pnand %p368_p10, %p597_p5  ;;  %s636_s30 = int_to_ptr.vmem [resolvable:$true] %s128_s30 }
  0x17   : > { %s118_s4 = scalar_lea.sflag [#allocation3], %s617_s23  ;;  %s408_s5 = scalar_lea.hbm %s626_s28, 128 }
  0x18   : > { %p409_p2 = scmp.ne.s32.totalorder %s626_s28, %s408_s5  ;;  %p410_p3 = pneg %p632_p13 }
  0x19   : > { %s413_s8 = scalar_lea.hbm %s772_s0, 256  ;;  %p414_p5 = scmp.lt.u32.totalorder %s626_s28, %s772_s0 }
  0x1a   : > { %p411_p4 = pnand %p410_p3, %p409_p2  ;;  %p415_p8 = scmp.lt.u32.totalorder %s413_s8, %s408_s5 }
  0x1b   : > { %p417_p9 = scmp.lt.u32.totalorder %s408_s5, %s626_s28 }
  0x1c   : > { %p412_p7 = pneg %p411_p4  ;;  %p416_p10 = por %p415_p8, %p414_p5 }
  0x1e   : > { %p418_p0 = por %p417_p9, %p416_p10 }
  0x20   : > { %p419_p1 = pnand %p418_p0, %p412_p7 }
  0x22   : > { %422 = shalt.err (!%p419_p1)
}
  0x23   : > { %s423_s17 = scalar_lea.vmem %s636_s30, 128  ;;  %s540_s19 = smov [#allocation2]  }
  0x24   : > { %p424_p2 = scmp.ne.s32.totalorder %s636_s30, %s423_s17  ;;  %s428_s26 = sshll.u32 %s540_s19, 4  ;;  %s429_s26 = int_to_ptr.vmem [resolvable:$false] %s428_s26 }
  0x25   : > { %s430_s27 = scalar_lea.vmem %s429_s26, 256  ;;  %p431_p11 = scmp.lt.s32.totalorder %s636_s30, %s429_s26 }
  0x26   : > { %p426_p4 = pnand %p424_p2, %p410_p3  ;;  %p432_p5 = scmp.lt.s32.totalorder %s430_s27, %s423_s17 }
  0x28   : > { %p427_p12 = pneg %p426_p4  ;;  %p433_p8 = por %p432_p5, %p431_p11 }
  0x2a   : > { %p434_p9 = pnand %p433_p8, %p427_p12 }
  0x2c   : > { %437 = shalt.err (!%p434_p9)
}
  0x2d   : > { %360 = dma.hbm_to_vmem [thread:$0]  (!%p632_p13), %s626_s28, 128, %s636_s30, %s118_s4  }
  0x2e   : > { %p782_p0 = scmp.lt.s32.totalorder %s538_s12, 3  ;;  %p783_p1 = scmp.ge.s32.totalorder %s538_s12, 1 }
  0x2f   : > { %s679_s7 = scalar_lea.hbm %s773_s1, %s340_s24  ;;  %s139_s8 = scalar_lea.vmem [#allocation5], %s339_s25 }
  0x30   : > { %p670_p7 = pnand %p783_p1, %p782_p0  ;;  %s146_s14 = sshll.u32 %s139_s8, 4  ;;  %s147_s14 = int_to_ptr.vmem [resolvable:$true] %s146_s14 }
  0x31   : > { %s136_s28 = scalar_lea.sflag [#allocation6], %s617_s23  ;;  %s438_s30 = scalar_lea.hbm %s679_s7, 128 }
  0x32   : > { %s784_s29 = scalar_select %p670_p7, 1, 0 }
  0x33   : > { %p439_p11 = scmp.ne.s32.totalorder %s679_s7, %s438_s30  ;;  %s443_s24 = scalar_lea.hbm %s773_s1, 256 }
  0x34   : > { %p444_p2 = scmp.lt.u32.totalorder %s679_s7, %s773_s1  ;;  %p445_p4 = scmp.lt.u32.totalorder %s443_s24, %s438_s30 }
  0x35   : > { %p441_p12 = pnand %p439_p11, %p410_p3  ;;  %p447_p8 = scmp.lt.u32.totalorder %s438_s30, %s679_s7 }
  0x36   : > { %p446_p5 = por %p445_p4, %p444_p2 }
  0x37   : > { %p442_p10 = pneg %p441_p12 }
  0x38   : > { %p448_p9 = por %p447_p8, %p446_p5 }
  0x3a   : > { %p449_p0 = pnand %p448_p9, %p442_p10 }
  0x3c   : > { %452 = shalt.err (!%p449_p0)
}
  0x3d   : > { %s453_s23 = scalar_lea.vmem %s147_s14, 128  ;;  %s541_s25 = smov [#allocation5]  }
  0x3e   : > { %p454_p1 = scmp.ne.s32.totalorder %s147_s14, %s453_s23  ;;  %s458_s26 = sshll.u32 %s541_s25, 4  ;;  %s459_s26 = int_to_ptr.vmem [resolvable:$false] %s458_s26 }
  0x3f   : > { %s460_s27 = scalar_lea.vmem %s459_s26, 256  ;;  %p461_p6 = scmp.lt.s32.totalorder %s147_s14, %s459_s26 }
  0x40   : > { %p456_p11 = pnand %p454_p1, %p410_p3  ;;  %p462_p7 = scmp.lt.s32.totalorder %s460_s27, %s453_s23 }
  0x42   : > { %p457_p12 = pneg %p456_p11  ;;  %p463_p2 = por %p462_p7, %p461_p6 }
  0x44   : > { %p464_p4 = pnand %p463_p2, %p457_p12 }
  0x46   : > { %467 = shalt.err (!%p464_p4)
}
  0x47   : > { %363 = dma.hbm_to_vmem [thread:$0]  (!%p632_p13), %s679_s7, 128, %s147_s14, %s136_s28  }
  0x48   : > { %p785_p10 = scmp.ne.s32.totalorder %s784_s29, 0 }
  0x49   : > { %s706_s5 = sand.u32 (!%p785_p10), 1, %s530_s10   ;;  %p786_p6 = scmp.ne.s32.totalorder (!%p785_p10), %s778_s20, 0 }
  0x4a   : > { %155 = sbr.rel (%p785_p10) target bundleno = 140 (0x8c), region = 28  ;;  %s709_s6 = sshll.u32 (!%p785_p10), %s706_s5, 3 }
  0x4b   : > { %s158_s8 = scalar_lea.sflag (!%p785_p10), [#allocation3], %s706_s5  ;;  %s161_s30 = scalar_lea.vmem (!%p785_p10), [#allocation2], %s709_s6 }
  0x51   : > { %513 = dma.done.wait (%p786_p6), %s158_s8, 128  }
  0x52   : > { %515 = vsyncadd (%p786_p6), %s158_s8, 4294967168  ;;  %s167_s3 = scalar_lea.sflag [#allocation6], %s706_s5  ;;  %s170_s29 = scalar_lea.vmem [#allocation5], %s709_s6 }
  0x53   : > { %517 = dma.done.wait (%p786_p6), %s167_s3, 128  }
  0x54   : > { %519 = vsyncadd (%p786_p6), %s167_s3, 4294967168  ;;  %v196_v0 = vld [vmem:[%s161_s30] sm:$0xff]  ;;  %v197_v8 = vld [vmem:[%s170_s29] sm:$0xff]  ;;  %s195_s20 = scalar_lea.vmem [#allocation7], %s709_s6  ;;  %s348_s14 = sshll.u32 %s579_s13, 7 }
  0x55   : > { %v198_v1 = vand.u32 2147483647, %v196_v0  ;;  %vm221_vm2 = vcmp.ge.f32.partialorder %v197_v8, 0.5  ;;  %s243_s7 = sshll.u32 %s195_s20, 4  ;;  %s730_s16 = scalar_lea.hbm %s774_s2, %s348_s14  ;;  %s725_s7 = int_to_ptr.vmem [resolvable:$true] %s243_s7 }
  0x56   : > { %s230_s24 = scalar_lea.sflag [#allocation4], %s706_s5  ;;  %s468_s17 = scalar_lea.vmem %s725_s7, 128 }
  0x57   : > { %vm199_vm0 = vcmp.lt.f32.partialorder %v198_v1, inf  ;;  %p469_p13 = scmp.ne.s32.totalorder %s725_s7, %s468_s17  ;;  %p787_p3 = scmp.ne.s32.totalorder %s779_s21, 0 }
  0x58   : > { %v201_v2 = vsel %vm199_vm0, %v198_v1, 0.0  ;;  %v200_v9 = vsel %vm199_vm0, %v196_v0, 0.0  ;;  %s542_s13 = smov [#allocation7]  }
  0x59   : > { %v202_v3 = vsub.f32 0.0, %v201_v2  ;;  %v205_v11 = vmax.f32 %v200_v9, 0.0  ;;  %v206_v12 = vmul.f32 %v200_v9, %v197_v8  ;;  %vm220_vm1 = vcmp.lt.f32.partialorder %v200_v9, 0.0  ;;  %p470_p7 = pnand %p469_p13, %p787_p3  ;;  %s472_s19 = sshll.u32 %s542_s13, 4  ;;  %s473_s19 = int_to_ptr.vmem [resolvable:$false] %s472_s19 }
  0x5a   : > { %vm222_vm4 = vmxor %vm220_vm1, %vm221_vm2  ;;  %s474_s23 = scalar_lea.vmem %s473_s19, 256  ;;  %p475_p8 = scmp.lt.s32.totalorder %s725_s7, %s473_s19 }
  0x5b   : > { %v203_v4 = vmul.f32 1.442695, %v202_v3  ;;  %v207_v16 = vsub.f32 %v205_v11, %v206_v12  ;;  %p471_p5 = pneg %p470_p7  ;;  %p476_p9 = scmp.lt.s32.totalorder %s474_s23, %s468_s17 }
  0x5d   : > { %402 = vpow2.f32 %v203_v4  ;;  %p477_p0 = por %p476_p9, %p475_p8 }
  0x5f   : > { %p478_p1 = pnand %p477_p0, %p471_p5 }
  0x67   : > { %v403_v5 = vpop.eup %402 }
  0x68   : > { %v208_v6 = vadd.f32 1.0, %v403_v5  ;;  %v211_v7 = vmul.f32 -0.5, %v403_v5  ;;  %v214_v13 = vand.u32 2147483647, %v403_v5 }
  0x6a   : > { %404 = vlog2.f32 %v208_v6  ;;  %v212_v10 = vadd.f32 1.0, %v211_v7  ;;  %vm215_vm3 = vcmp.lt.f32.partialorder %v214_v13, 0.0004427343 }
  0x6b   : > { %406 = vrcp.f32 %v208_v6 }
  0x6c   : > { %v213_v14 = vmul.f32 %v403_v5, %v212_v10 }
  0x74   : > { %v405_v15 = vpop.eup %404 }
  0x75   : > { %v407_v17 = vpop.eup %406  ;;  %v210_v18 = vmul.f32 0.6931472, %v405_v15 }
  0x76   : > { %v223_v19 = vmul.f32 %v407_v17, %v403_v5 }
  0x77   : > { %v216_v20 = vsel %vm215_vm3, %v213_v14, %v210_v18 }
  0x78   : > { %v217_v21 = vadd.f32 %v216_v20, %v207_v16  ;;  %v224_v22 = vsel %vm222_vm4, %v223_v19, %v407_v17 }
  0x7a   : > { %v225_v23 = vmul.f32 %v224_v22, %v217_v21 }
  0x7c   : > { %v226_v24 = vmul.f32 %v225_v23, %v224_v22 }
  0x7e   : > { %228 = vst [vmem:[%s195_s20] sm:$0xff] %v226_v24 }
  0x7f   : > { %481 = shalt.err (!%p478_p1)
}
  0x80   : > { %s482_s25 = scalar_lea.hbm %s730_s16, 128  ;;  %s486_s5 = scalar_lea.hbm %s774_s2, 256 }
  0x81   : > { %p483_p11 = scmp.ne.s32.totalorder %s730_s16, %s482_s25  ;;  %p487_p4 = scmp.lt.u32.totalorder %s730_s16, %s774_s2 }
  0x82   : > { %p488_p10 = scmp.lt.u32.totalorder %s486_s5, %s482_s25  ;;  %p490_p13 = scmp.lt.u32.totalorder %s482_s25, %s730_s16 }
  0x83   : > { %p484_p12 = pnand %p483_p11, %p787_p3 }
  0x84   : > { %p489_p6 = por %p488_p10, %p487_p4 }
  0x85   : > { %p485_p2 = pneg %p484_p12 }
  0x86   : > { %p491_p7 = por %p490_p13, %p489_p6 }
  0x88   : > { %p492_p5 = pnand %p491_p7, %p485_p2 }
  0x8a   : > { %495 = shalt.err (!%p492_p5)
}
  0x8b   : > { %355 = dma.vmem_to_hbm [thread:$0]  (%p787_p3), %s725_s7, 128, %s730_s16, %s230_s24  }
  0x8c PF: > { %s255_s30 = sand.u32 1, %s526_s9   ;;  %p788_p8 = scmp.ne.s32.totalorder %s780_s22, 0 }
  0x8d   : > { %p789_p9 = scmp.ge.s32.totalorder %s538_s12, 2  ;;  %s256_s3 = scalar_lea.sflag [#allocation4], %s255_s30 }
  0x8f   : > { %p365_p0 = pnand %p789_p9, %p788_p8 }
  0x91   : > { %521 = dma.done.wait (!%p365_p0), %s256_s3, 128  }
  0x92   : > { %523 = vsyncadd (!%p365_p0), %s256_s3, 4294967168  ;;  %p18_p1 = scmp.ge.s32.totalorder %s583_s15, 4   ;;  %s790_s9 = smov %s530_s10 }
  0x93   : > { %s791_s10 = smov %s534_s11  ;;  %s792_s11 = smov %s595_s18 }
  0x94   : > { %s793_s12 = smov %s583_s15  ;;  %20 = sbr.rel (!%p18_p1) target bundleno = 7 (0x7), region = 86 }
  0x9b   :  { %261 = vsyncpa [#allocation3], 1 }
  0x9c   :  { %263 = vsyncpa [#allocation3 + $0x1], 1 }
  0x9d   :  { %264 = vsyncpa [#allocation6], 1 }
  0x9e   :  { %266 = vsyncpa [#allocation6 + $0x1], 1 }
  0x9f   :  { %267 = vsyncpa [#allocation4], 1 }
  0xa0   :  { %269 = vsyncpa [#allocation4 + $0x1], 1 }

</bundles_post_ra>
